<compile_context>
chip_gen: v7x
topology: tpu7x:2x2x1
jax: 0.10.0
libtpu: 0.0.40
codegen_flags: <defaults>
</compile_context>

<pallas_src>
import numpy as np
import jax
import jax.numpy as jnp
from jax import lax
from jax.experimental import pallas as pl
from jax.experimental.pallas import tpu as pltpu

TILE = 4               # hard-coded "kernel = 4" in the reference module
LANE_BLOCK_CAP = 32768 # lanes per kernel-1 grid step (~2 MiB f32 input block)


def _round_up(x, m):
    return ((x + m - 1) // m) * m


# ----------------------------------------------------------------------------
# Kernel 1: per-4x4-tile max + first-occurrence argmax (np.argmax semantics)
# ----------------------------------------------------------------------------
def _tile_max_kernel(tiles_ref, vals_ref, argk_ref):
    x = tiles_ref[...].astype(jnp.float32)                 # (16, tb)
    k = lax.broadcasted_iota(jnp.int32, x.shape, 0)        # in-tile index 0..15
    vmax = jnp.max(x, axis=0, keepdims=True)               # (1, tb) tile max
    # first index attaining the max == np.argmax
    first_k = jnp.min(jnp.where(x == vmax, k, TILE * TILE),
                      axis=0, keepdims=True)               # (1, tb)
    vals_ref[...] = vmax
    argk_ref[...] = first_k


def tiled_detect_keypoints(scores_map, *, radius=2, top_k=500):
    _, _, h, w = scores_map.shape
    assert h % TILE == 0 and w % TILE == 0
    n_th, n_tw = h // TILE, w // TILE
    t_total = n_th * n_tw

    # Border zeroing fused into the XLA repack (cheap elementwise `where` that
    # fuses with the transpose).  Keeps kernel 1 HBM-bound instead of
    # VALU-bound on v6e/v7x.
    sm = scores_map[0, 0]
    row = jnp.arange(h, dtype=jnp.int32)[:, None]
    col = jnp.arange(w, dtype=jnp.int32)[None, :]
    border = ((row < radius + 1) | (col < radius + 1) |
              (row >= h - radius) | (col >= w - radius))
    sm = jnp.where(border, jnp.zeros((), sm.dtype), sm)

    # (H, W) -> (16, T) repack; kept in the input dtype (bf16 halves DMA bytes).
    # TODO(synk): a native-layout in-kernel 4x4 reduce (row strips + pltpu.roll
    # lane-group max) would save this one transpose pass for very large maps.
    tiles = (sm.reshape(n_th, TILE, n_tw, TILE)
               .transpose(1, 3, 0, 2)
               .reshape(TILE * TILE, t_total))

    # Large lane blocks; single grid step whenever T fits one block (no forced
    # 2-way split on single-TensorCore chips), multiple parallel steps for
    # large maps (lets v7x's two TCs split the grid).  No input padding: the
    # last block may be partial (OOB input lanes are unspecified and their
    # output stores are dropped by Pallas' edge-block masking).
    tb = min(_round_up(t_total, 128), LANE_BLOCK_CAP)
    n_steps = pl.cdiv(t_total, tb)

    vals, argk = pl.pallas_call(
        _tile_max_kernel,
        out_shape=(jax.ShapeDtypeStruct((1, t_total), jnp.float32),
                   jax.ShapeDtypeStruct((1, t_total), jnp.int32)),
        grid_spec=pltpu.PrefetchScalarGridSpec(
            num_scalar_prefetch=0,
            grid=(n_steps,),
            in_specs=[pl.BlockSpec((TILE * TILE, tb), lambda j: (0, j))],
            out_specs=[pl.BlockSpec((1, tb), lambda j: (0, j)),
                       pl.BlockSpec((1, tb), lambda j: (0, j))]),
        compiler_params=pltpu.CompilerParams(
            dimension_semantics=("parallel",)),
    )(tiles)
    vals, argk = vals[0], argk[0]

    # Selection: O(T) lax.top_k instead of the O(T log T) full argsort.
    # Running top_k on the reversed array and flipping the result reproduces
    # the stable ascending-argsort tail semantics (among equal scores at the
    # cut the larger tile index is kept; output ascending by score, then by
    # tile index), relying on top_k's documented lower-index-first tie rule.
    k_eff = min(top_k, t_total)
    tv_rev, pos_rev = lax.top_k(vals[::-1], k_eff)
    sel = (t_total - 1 - pos_rev)[::-1].astype(jnp.int32)  # ascending-score order
    top_values = tv_rev[::-1]
    kk = argk[sel]                                          # in-tile argmax 0..15
    th = sel // n_tw
    tc = sel % n_tw
    top_rows = th * TILE + kk // TILE
    top_cols = tc * TILE + kk % TILE
    keypoints_xy = jnp.stack([top_cols, top_rows], axis=1)  # (K, 2) = [x, y]
    return keypoints_xy, top_values


# ----------------------------------------------------------------------------
# Kernel 2: single-block, lane-dense L2 normalization of gathered descriptors
# ----------------------------------------------------------------------------
def _l2norm_kernel(d_ref, o_ref):
    d = d_ref[...]                                          # (C, K_pad) f32
    ssq = jnp.sum(d * d, axis=0, keepdims=True)             # (1, K_pad)
    # No epsilon on purpose: matches the reference's plain divide-by-norm.
    o_ref[...] = d * lax.rsqrt(ssq)


def sample_descriptor(descriptor_map, keypoints_xy):
    _, c, h, w = descriptor_map.shape
    n = keypoints_xy.shape[0]
    rows = keypoints_xy[:, 1]
    cols = keypoints_xy[:, 0]
    # TODO(synk): the K-point gather stays in XLA (reads only K*C values from
    # the native (C,H,W) layout); per-keypoint strided C x 4B DMAs in Pallas
    # would be strictly worse.
    gathered = descriptor_map[0][:, rows, cols].astype(jnp.float32)   # (C, N)

    n_pad = _round_up(n, 128)
    if n_pad != n:   # pad lanes with 1.0 so they normalize to finite junk
        gathered = jnp.pad(gathered, ((0, 0), (0, n_pad - n)),
                           constant_values=1.0)

    # Single whole-array block, grid=(1,): one DMA in, one out, one launch.
    out = pl.pallas_call(
        _l2norm_kernel,
        out_shape=jax.ShapeDtypeStruct((c, n_pad), jnp.float32),
        grid_spec=pltpu.PrefetchScalarGridSpec(
            num_scalar_prefetch=0,
            grid=(1,),
            in_specs=[pl.BlockSpec((c, n_pad), lambda j: (0, 0))],
            out_specs=pl.BlockSpec((c, n_pad), lambda j: (0, 0))),
    )(gathered)
    out = out[:, :n]                        # (C, N), drop padded lanes
    # reference returns (1, C, N).T == (N, C, 1); transpose of a K*C array only.
    return jnp.transpose(out)[:, :, None]


def dkd_forward(scores_map, descriptor_map, *, radius=2, top_k=500):
    keypoints, kptscores = tiled_detect_keypoints(scores_map,
                                                  radius=radius, top_k=top_k)
    descriptors = sample_descriptor(descriptor_map, keypoints)
    return keypoints, descriptors, kptscores


# ----------------------------------------------------------------------------
# Pure-numpy mirror of the PyTorch module (for a sanity check)
# ----------------------------------------------------------------------------
def _numpy_reference(scores_np, desc_np, radius, top_k):
    sm = scores_np.copy()
    _, _, h, w = sm.shape
    sm[:, :, :radius + 1, :] = 0
    sm[:, :, :, :radius + 1] = 0
    sm[:, :, h - radius:, :] = 0
    sm[:, :, :, w - radius:] = 0
    kernel = 4
    image = sm[0, 0]
    ih, iw = image.shape
    tiles = (image.reshape(ih // kernel, kernel, iw // kernel, kernel)
             .swapaxes(1, 2)
             .reshape(ih // kernel, iw // kernel, kernel * kernel))
    nth, ntw, _ = tiles.shape
    am = np.argmax(tiles, axis=2)
    values = np.take_along_axis(tiles, am[:, :, None], axis=2).squeeze()
    gri = (np.arange(nth) * kernel)[:, None] + am // kernel
    gci = (np.arange(ntw) * kernel) + am % kernel
    flat = np.argsort(values.ravel(), kind='stable')[-top_k:]
    tv = values.ravel()[flat]
    tri = gri.ravel()[flat]
    tci = gci.ravel()[flat]
    kp = np.vstack((tci, tri)).T
    d = desc_np[:, :, kp[:, 1], kp[:, 0]]                  # (1, C, N)
    d = d / np.linalg.norm(d, axis=1)
    return kp, np.transpose(d, (2, 1, 0)), tv              # (N,2), (N,C,1), (N,)


if __name__ == "__main__":
    key = jax.random.PRNGKey(0)
    k1, k2 = jax.random.split(key)
    H, W, C = 32, 32, 32
    radius, top_k = 2, 500

    scores_map = jax.nn.sigmoid(jax.random.normal(k1, (1, 1, H, W), jnp.float32))
    descriptor_map = jax.random.normal(k2, (1, C, H, W), jnp.float32)

    kpts, descs, kscores = dkd_forward(scores_map, descriptor_map,
                                       radius=radius, top_k=top_k)
    kpts, descs, kscores = jax.block_until_ready((kpts, descs, kscores))

    # sanity check against the numpy mirror of the PyTorch module
    kp_ref, d_ref, tv_ref = _numpy_reference(np.asarray(scores_map),
                                             np.asarray(descriptor_map),
                                             radius, top_k)
    np.testing.assert_array_equal(np.asarray(kpts), kp_ref)
    np.testing.assert_allclose(np.asarray(kscores), tv_ref, rtol=1e-5, atol=1e-5)
    np.testing.assert_allclose(np.asarray(descs), d_ref, rtol=1e-4, atol=1e-4)

    print("KERNEL_OK")
</pallas_src>

<mosaic_0001>
module attributes {stable_mosaic.version = 11 : i64} {
  func.func @_tile_max_kernel(%arg0: i32, %arg1: memref<16x128xf32, #tpu.memory_space<vmem>>, %arg2: memref<1x128xf32, #tpu.memory_space<vmem>>, %arg3: memref<1x128xi32, #tpu.memory_space<vmem>>) attributes {dimension_semantics = [#tpu.dimension_semantics<parallel>], iteration_bounds = array<i64: 1>, scalar_prefetch = 0 : i64, scratch_operands = 0 : i64, tpu.core_type = #tpu.core_type<tc>, window_params = [{transform_indices = @transform_0, window_bounds = array<i64: 16, 128>}, {transform_indices = @transform_1, window_bounds = array<i64: 1, 128>}, {transform_indices = @transform_2, window_bounds = array<i64: 1, 128>}]} {
    %c0 = arith.constant 0 : index
    %c0_0 = arith.constant 0 : index
    %0 = vector.load %arg1[%c0, %c0_0] : memref<16x128xf32, #tpu.memory_space<vmem>>, vector<16x128xf32>
    %1 = tpu.iota {dimensions = array<i32: 0>} : vector<16x128xi32>
    %cst = arith.constant dense<0xFF800000> : vector<128xf32>
    %2 = vector.multi_reduction <maximumf>, %0, %cst [0] : vector<16x128xf32> to vector<128xf32>
    %3 = vector.shape_cast %2 : vector<128xf32> to vector<1x128xf32>
    %4 = vector.broadcast %3 : vector<1x128xf32> to vector<16x128xf32>
    %5 = arith.cmpf oeq, %0, %4 : vector<16x128xf32>
    %c16_i32 = arith.constant 16 : i32
    %6 = vector.broadcast %c16_i32 : i32 to vector<16x128xi32>
    %7 = arith.select %5, %1, %6 : vector<16x128xi1>, vector<16x128xi32>
    %cst_1 = arith.constant dense<2147483647> : vector<128xi32>
    %8 = vector.multi_reduction <minsi>, %7, %cst_1 [0] : vector<16x128xi32> to vector<128xi32>
    %9 = vector.shape_cast %8 : vector<128xi32> to vector<1x128xi32>
    %c0_2 = arith.constant 0 : index
    %c0_3 = arith.constant 0 : index
    %10 = vector.load %arg2[%c0_2, %c0_3] : memref<1x128xf32, #tpu.memory_space<vmem>>, vector<1x128xf32>
    tpu.vector_store %arg2[%c0_2, %c0_3], %3 {strides = array<i32>} : memref<1x128xf32, #tpu.memory_space<vmem>>, vector<1x128xf32>,
    %c0_4 = arith.constant 0 : index
    %c0_5 = arith.constant 0 : index
    %11 = vector.load %arg3[%c0_4, %c0_5] : memref<1x128xi32, #tpu.memory_space<vmem>>, vector<1x128xi32>
    tpu.vector_store %arg3[%c0_4, %c0_5], %9 {strides = array<i32>} : memref<1x128xi32, #tpu.memory_space<vmem>>, vector<1x128xi32>,
    return
  }
  func.func @transform_0(%arg0: i32) -> (i32, i32) {
    %c0_i32 = arith.constant 0 : i32
    %c0_i32_0 = arith.constant 0 : i32
    return %c0_i32, %arg0 : i32, i32
  }
  func.func @transform_1(%arg0: i32) -> (i32, i32) {
    %c0_i32 = arith.constant 0 : i32
    %c0_i32_0 = arith.constant 0 : i32
    return %c0_i32, %arg0 : i32, i32
  }
  func.func @transform_2(%arg0: i32) -> (i32, i32) {
    %c0_i32 = arith.constant 0 : i32
    %c0_i32_0 = arith.constant 0 : i32
    return %c0_i32, %arg0 : i32, i32
  }
}

</mosaic_0001>

<bundles_post_ra>
// kernel: tpu_custom_call.1
= control target key start
LH: loop header
LB: loop body
LE: loop exit
PB: predicated region body
PF: predicated region fallthrough
CT: control target
= control target key end

     0   :  { %8 = vsyncpa [#allocation3], 0  ;;  %s217_s0 = inlined_call_operand.hbm [shape: f32[16,64], index: 0, kind: input, shape index: {}]   ;;  %s218_s1 = inlined_call_operand.hbm [shape: f32[1,64], index: 1, kind: output, shape index: {0}]   ;;  %s219_s2 = inlined_call_operand.hbm [shape: s32[1,64], index: 2, kind: output, shape index: {1}]  }
   0x1   :  { %9 = vsyncpa [#allocation4], 0 }
   0x2   :  { %10 = vsyncpa [#allocation7], 0  ;;  %s161_s9 = smov [#allocation2]   ;;  %s89_s13 = scalar_lea.hbm %s217_s0, 256 }
   0x3   :  { %s16_s10 = sshll.u32 %s161_s9, 4  ;;  %p90_p0 = scmp.ne.s32.totalorder %s217_s0, %s89_s13  ;;  %s17_s10 = int_to_ptr.vmem [resolvable:$true] %s16_s10 }
   0x4   :  { %p93_p1 = scmp.lt.u32.totalorder %s89_s13, %s217_s0 }
   0x6   :  { %p95_p2 = pnand %p93_p1, %p90_p0 }
   0x8   :  { %98 = shalt.err (!%p95_p2)
}
   0x9   :  { %s99_s18 = scalar_lea.vmem %s17_s10, 256  ;;  %p104_p4 = scmp.lt.s32.totalorder %s17_s10, %s17_s10 }
   0xa   :  { %p100_p3 = scmp.ne.s32.totalorder %s17_s10, %s99_s18  ;;  %p105_p5 = scmp.lt.s32.totalorder %s99_s18, %s99_s18 }
   0xc   :  { %p106_p6 = por %p105_p5, %p104_p4 }
   0xe   :  { %p107_p7 = pnand %p106_p6, %p100_p3 }
  0x10   :  { %110 = shalt.err (!%p107_p7)
}
  0x11   :  { %s162_s19 = smov 128   ;;  %s163_s20 = smov 8  }
  0x12   :  { %22 = dma.hbm_to_vmem [thread:$0]  %s217_s0, 256, %s17_s10, [#allocation3], %s162_s19, %s162_s19, %s163_s20  }
  0x13   :  { %155 = dma.done.wait [#allocation3], 256  }
  0x14   :  { %156 = vsyncadd [#allocation3], 4294967040  ;;  %v26_v0 = vld [vmem:[#allocation2] sm:$0xff]  ;;  %v27_v1 = vld [vmem:[#allocation2 + $0x8] sm:$0xff]  ;;  %v28_v4 = vlaneseq  ;;  %s164_s23 = smov [#allocation5]  }
  0x15   :  { %v31_v2 = vmax.f32 %v26_v0, %v27_v1  ;;  %s61_s24 = sshll.u32 %s164_s23, 4  ;;  %s62_s24 = int_to_ptr.vmem [resolvable:$true] %s61_s24 }
  0x16   :  { %v29_v7 = vshrl.u32 %v28_v4, 7  ;;  %s111_s0 = scalar_lea.vmem %s62_s24, 16  ;;  %s115_s25 = scalar_lea.vmem %s62_s24, 32 }
  0x17   :  { %v32_v3 = vrot.slane %v31_v2, 4  ;;  %p112_p8 = scmp.ne.s32.totalorder %s62_s24, %s111_s0  ;;  %p116_p9 = scmp.lt.s32.totalorder %s62_s24, %s62_s24 }
  0x18   :  { %v30_v10 = vadd.s32 8, %v29_v7  ;;  %p117_p10 = scmp.lt.s32.totalorder %s115_s25, %s111_s0 }
  0x19   :  { %v33_v5 = vmax.f32 %v31_v2, %v32_v3 }
  0x1a   :  { %p118_p11 = por %p117_p10, %p116_p9 }
  0x1b   :  { %v34_v6 = vrot.slane %v33_v5, 2 }
  0x1c   :  { %p119_p12 = pnand %p118_p11, %p112_p8 }
  0x1d   :  { %v35_v8 = vmax.f32 %v33_v5, %v34_v6 }
  0x1f   :  { %v36_v9 = vrot.slane %v35_v8, 1 }
  0x21   :  { %v37_v11 = vmax.f32 %v35_v8, %v36_v9 }
  0x23   :  { %vm38_vm0 = vcmp.eq.f32.partialorder %v26_v0, %v37_v11  ;;  %vm39_vm1 = vcmp.eq.f32.partialorder %v27_v1, %v37_v11  ;;  %53 = vst [vmem:[#allocation5] sm:$0x1] %v37_v11 }
  0x24   :  { %v40_v12 = vsel %vm38_vm0, %v29_v7, 16  ;;  %v41_v13 = vsel %vm39_vm1, %v30_v10, 16 }
  0x25   :  { %122 = shalt.err (!%p119_p12)
}
  0x26   :  { %s123_s28 = scalar_lea.hbm %s218_s1, 16 }
  0x27   :  { %p124_p13 = scmp.ne.s32.totalorder %s218_s1, %s123_s28  ;;  %p127_p0 = scmp.lt.u32.totalorder %s123_s28, %s218_s1 }
  0x29   :  { %p129_p1 = pnand %p127_p0, %p124_p13 }
  0x2b   :  { %132 = shalt.err (!%p129_p1)
}
  0x2c   :  { %64 = dma.vmem_to_hbm [thread:$0]  %s62_s24, 16, %s218_s1, [#allocation4]   ;;  %vm42_vm2 = vcmp.lt.s32.totalorder %v40_v12, %v41_v13 }
  0x2d   :  { %v43_v14 = vsel %vm42_vm2, %v40_v12, %v41_v13  ;;  %s165_s7 = smov [#allocation6]  }
  0x2e   :  { %v44_v15 = vrot.slane %v43_v14, 4  ;;  %s71_s8 = sshll.u32 %s165_s7, 4  ;;  %s72_s8 = int_to_ptr.vmem [resolvable:$true] %s71_s8 }
  0x2f   :  { %s133_s9 = scalar_lea.vmem %s72_s8, 16  ;;  %s137_s10 = scalar_lea.vmem %s72_s8, 32 }
  0x30   :  { %vm45_vm3 = vcmp.lt.s32.totalorder %v43_v14, %v44_v15  ;;  %p134_p2 = scmp.ne.s32.totalorder %s72_s8, %s133_s9  ;;  %p138_p3 = scmp.lt.s32.totalorder %s72_s8, %s72_s8 }
  0x31   :  { %v46_v16 = vsel %vm45_vm3, %v43_v14, %v44_v15  ;;  %p139_p4 = scmp.lt.s32.totalorder %s137_s10, %s133_s9 }
  0x32   :  { %v47_v17 = vrot.slane %v46_v16, 2 }
  0x33   :  { %p140_p5 = por %p139_p4, %p138_p3 }
  0x34   :  { %vm48_vm4 = vcmp.lt.s32.totalorder %v46_v16, %v47_v17 }
  0x35   :  { %v49_v18 = vsel %vm48_vm4, %v46_v16, %v47_v17  ;;  %p141_p6 = pnand %p140_p5, %p134_p2 }
  0x36   :  { %v50_v19 = vrot.slane %v49_v18, 1 }
  0x38   :  { %vm51_vm5 = vcmp.lt.s32.totalorder %v49_v18, %v50_v19 }
  0x39   :  { %v52_v20 = vsel %vm51_vm5, %v49_v18, %v50_v19 }
  0x3a   :  { %54 = vst [vmem:[#allocation6] sm:$0x1] %v52_v20 }
  0x3b   :  { %144 = shalt.err (!%p141_p6)
}
  0x3c   :  { %s145_s12 = scalar_lea.hbm %s219_s2, 16 }
  0x3d   :  { %p146_p7 = scmp.ne.s32.totalorder %s219_s2, %s145_s12  ;;  %p149_p8 = scmp.lt.u32.totalorder %s145_s12, %s219_s2 }
  0x3f   :  { %p151_p9 = pnand %p149_p8, %p146_p7 }
  0x41   :  { %154 = shalt.err (!%p151_p9)
}
  0x42   :  { %74 = dma.vmem_to_hbm [thread:$0]  %s72_s8, 16, %s219_s2, [#allocation7]  }
  0x43   :  { %157 = dma.done.wait [#allocation4], 16  }
  0x44   :  { %158 = vsyncadd [#allocation4], 4294967280 }
  0x45   :  { %159 = dma.done.wait [#allocation7], 16  }
  0x46   :  { %160 = vsyncadd [#allocation7], 4294967280 }
  0x47   :  { %81 = vsyncpa [#allocation3], 1 }
  0x48   :  { %82 = vsyncpa [#allocation4], 1 }
  0x49   :  { %83 = vsyncpa [#allocation7], 1 }

</bundles_post_ra>
